<compile_context>
chip_gen: v5e
topology: v5e:2x2
jax: 0.10.0
libtpu: 0.0.40
codegen_flags: <defaults>
</compile_context>

<pallas_src>
import numpy as np
import jax
import jax.numpy as jnp
from jax import lax
from jax.experimental import pallas as pl
from jax.experimental.pallas import tpu as pltpu

# ---- model hyperparameters (match the PyTorch defaults) --------------------
EMBED_DIM = 16
NUM_HEADS = 2
HEAD_DIM = EMBED_DIM // NUM_HEADS

# ---- small example shapes ---------------------------------------------------
BATCH = 2
SEQ = 8


def _make_kernel(B, N, E, H, D):
    def qmhsa_kernel(x_ref, wqkv_ref, wout_ref, amp_ref, o_ref, slab_ref):
        f32 = jnp.float32
        xr = x_ref[...]                                             # (B*N, E)

        # single fused projection -> [q_r | q_i | k_r | k_i | v_r | v_i]
        # (1/sqrt(D) already folded into the q columns on the host)
        qkv = jnp.dot(xr, wqkv_ref[...], preferred_element_type=f32)  # (B*N, 6E)
        amp = amp_ref[0]

        qr, qi = qkv[:, 0 * E:1 * E], qkv[:, 1 * E:2 * E]
        kr, ki = qkv[:, 2 * E:3 * E], qkv[:, 3 * E:4 * E]
        vr, vi = qkv[:, 4 * E:5 * E], qkv[:, 5 * E:6 * E]

        # contract the last dim of both operands: q @ k^T without explicit .T
        dn = (((1,), (1,)), ((), ()))

        # B and H are tiny static constants -> static Python loops / slices.
        for b in range(B):
            r0, r1 = b * N, (b + 1) * N
            for h in range(H):
                c0, c1 = h * D, (h + 1) * D
                qhr, qhi = qr[r0:r1, c0:c1], qi[r0:r1, c0:c1]
                khr, khi = kr[r0:r1, c0:c1], ki[r0:r1, c0:c1]
                vhr, vhi = vr[r0:r1, c0:c1], vi[r0:r1, c0:c1]

                # scores = q @ conj(k).T   (complex; scale pre-folded into Aq)
                s_r = (lax.dot_general(qhr, khr, dn, preferred_element_type=f32)
                       + lax.dot_general(qhi, khi, dn, preferred_element_type=f32))
                s_i = (lax.dot_general(qhi, khr, dn, preferred_element_type=f32)
                       - lax.dot_general(qhr, khi, dn, preferred_element_type=f32))

                # softmax over |scores| * amplification
                mag = jnp.sqrt(s_r * s_r + s_i * s_i) * amp
                m = jnp.max(mag, axis=-1, keepdims=True)
                e = jnp.exp(mag - m)
                attn = e * pl.reciprocal(jnp.sum(e, axis=-1, keepdims=True),
                                         approx=True)

                # write head outputs directly into the (B*N, 2E) slab
                slab_ref[r0:r1, c0:c1] = jnp.dot(
                    attn, vhr, preferred_element_type=f32)
                slab_ref[r0:r1, E + c0:E + c1] = jnp.dot(
                    attn, vhi, preferred_element_type=f32)

        # fused phase gate + linear_out + (real + 0.1*imag) readout:
        # o = [out_r | out_i] @ W_out
        o_ref[...] = jnp.dot(slab_ref[...], wout_ref[...],
                             preferred_element_type=f32)

    return qmhsa_kernel


def quantum_mhsa(x, A_q, A_k, A_v, A_o, theta, amplification):
    """x: (B, N, E) f32.  A_* : complex (E, E) = Q.conj().T."""
    B, N, E = x.shape
    assert E == EMBED_DIM
    H, D = NUM_HEADS, E // NUM_HEADS

    # ----- host-side weight fusion ------------------------------------------
    A_q = np.asarray(A_q, np.complex64) / np.sqrt(D)   # fold 1/sqrt(D) into q
    A_k = np.asarray(A_k, np.complex64)
    A_v = np.asarray(A_v, np.complex64)
    A_o = np.asarray(A_o, np.complex64)
    theta = np.asarray(theta, np.float32)

    W_qkv = np.concatenate(
        [A_q.real, A_q.imag, A_k.real, A_k.imag, A_v.real, A_v.imag],
        axis=1).astype(np.float32)                                  # (E, 6E)

    # o = p_r @ M1 + p_i @ M2 with p = out * exp(i*theta):
    #   o = out_r @ (diag(c)M1 + diag(s)M2) + out_i @ (diag(c)M2 - diag(s)M1)
    c = np.cos(theta)[:, None]
    s = np.sin(theta)[:, None]
    M1 = A_o.real + 0.1 * A_o.imag
    M2 = 0.1 * A_o.real - A_o.imag
    W_r = c * M1 + s * M2
    W_i = c * M2 - s * M1
    W_out = np.concatenate([W_r, W_i], axis=0).astype(np.float32)   # (2E, E)

    amp = jnp.asarray([amplification], jnp.float32)
    x2d = jnp.asarray(x, jnp.float32).reshape(B * N, E)

    kernel = _make_kernel(B, N, E, H, D)
    out2d = pl.pallas_call(
        kernel,
        out_shape=jax.ShapeDtypeStruct((B * N, E), jnp.float32),
        grid_spec=pltpu.PrefetchScalarGridSpec(
            num_scalar_prefetch=0,
            grid=(1,),                       # whole problem in one grid step
            in_specs=[
                pl.BlockSpec((B * N, E), lambda i: (0, 0)),      # x slab
                pl.BlockSpec((E, 6 * E), lambda i: (0, 0)),      # fused W_qkv
                pl.BlockSpec((2 * E, E), lambda i: (0, 0)),      # fused W_out
                pl.BlockSpec(memory_space=pltpu.SMEM),           # amplification
            ],
            out_specs=pl.BlockSpec((B * N, E), lambda i: (0, 0)),
            scratch_shapes=[pltpu.VMEM((B * N, 2 * E), jnp.float32)],
        ),
        compiler_params=pltpu.CompilerParams(
            dimension_semantics=("arbitrary",)),
    )(x2d, jnp.asarray(W_qkv), jnp.asarray(W_out), amp)
    return out2d.reshape(B, N, E)


# ------------------------- pure numpy reference ------------------------------
def reference_forward(x, Qq, Qk, Qv, Qo, theta, amplification):
    x = np.asarray(x)
    B, N, E = x.shape
    H, D = NUM_HEADS, HEAD_DIM
    xc = x.astype(np.complex64)
    q = xc @ Qq.conj().T
    k = xc @ Qk.conj().T
    v = xc @ Qv.conj().T

    def heads(t):
        return t.reshape(B, N, H, D).transpose(0, 2, 1, 3)

    q, k, v = heads(q), heads(k), heads(v)
    scores = q @ k.conj().transpose(0, 1, 3, 2) / np.sqrt(D)
    mag = np.abs(scores) * amplification
    mag = mag - mag.max(-1, keepdims=True)
    e = np.exp(mag)
    attn = (e / e.sum(-1, keepdims=True)).astype(np.complex64)
    out = attn @ v
    out = out.transpose(0, 2, 1, 3).reshape(B, N, E)
    out = out * np.exp(1j * theta.astype(np.complex64))
    outc = out @ Qo.conj().T
    return (outc.real + 0.1 * outc.imag).astype(np.float32)


if __name__ == "__main__":
    key = jax.random.PRNGKey(0)
    keys = jax.random.split(key, 11)

    def make_unitary(kr, ki):
        # UnitaryComplexLinear: random real+imag weights; forward takes QR.
        wr = np.asarray(jax.random.normal(kr, (EMBED_DIM, EMBED_DIM), jnp.float32))
        wi = np.asarray(jax.random.normal(ki, (EMBED_DIM, EMBED_DIM), jnp.float32))
        Q, _ = np.linalg.qr((wr + 1j * wi).astype(np.complex64))
        return Q.astype(np.complex64)

    Qq = make_unitary(keys[0], keys[1])
    Qk = make_unitary(keys[2], keys[3])
    Qv = make_unitary(keys[4], keys[5])
    Qo = make_unitary(keys[6], keys[7])

    # non-trivial phase / amplification to exercise the fused-weight paths
    theta = np.asarray(
        0.3 * jax.random.normal(keys[9], (EMBED_DIM,), jnp.float32), np.float32)
    amplification = 1.3

    x = jax.random.normal(keys[8], (BATCH, SEQ, EMBED_DIM), jnp.float32)

    # A = Q.conj().T so the kernel computes a plain right-multiplication x @ A.
    y = quantum_mhsa(x, Qq.conj().T, Qk.conj().T, Qv.conj().T, Qo.conj().T,
                     theta, amplification)
    y = jax.block_until_ready(y)

    y_ref = reference_forward(np.asarray(x), Qq, Qk, Qv, Qo, theta, amplification)
    np.testing.assert_allclose(np.asarray(y), y_ref, rtol=5e-2, atol=5e-2)

    print("KERNEL_OK")
</pallas_src>

<mosaic_0001>
module attributes {stable_mosaic.version = 11 : i64} {
  func.func @qmhsa_kernel(%arg0: i32, %arg1: memref<16x16xf32, #tpu.memory_space<vmem>>, %arg2: memref<16x96xf32, #tpu.memory_space<vmem>>, %arg3: memref<32x16xf32, #tpu.memory_space<vmem>>, %arg4: memref<1xf32, #tpu.memory_space<smem>>, %arg5: memref<16x16xf32, #tpu.memory_space<vmem>>, %arg6: memref<16x32xf32, #tpu.memory_space<vmem>>) attributes {dimension_semantics = [#tpu.dimension_semantics<arbitrary>], iteration_bounds = array<i64: 1>, scalar_prefetch = 0 : i64, scratch_operands = 1 : i64, tpu.core_type = #tpu.core_type<tc>, window_params = [{pipeline_mode = #tpu.pipeline_mode<synchronous>, transform_indices = @transform_0, window_bounds = array<i64: 16, 16>}, {pipeline_mode = #tpu.pipeline_mode<synchronous>, transform_indices = @transform_1, window_bounds = array<i64: 16, 96>}, {pipeline_mode = #tpu.pipeline_mode<synchronous>, transform_indices = @transform_2, window_bounds = array<i64: 32, 16>}, {transform_indices = @transform_3, window_bounds = array<i64: 1>}, {pipeline_mode = #tpu.pipeline_mode<synchronous>, transform_indices = @transform_4, window_bounds = array<i64: 16, 16>}]} {
    %c0 = arith.constant 0 : index
    %c0_0 = arith.constant 0 : index
    %0 = vector.load %arg1[%c0, %c0_0] : memref<16x16xf32, #tpu.memory_space<vmem>>, vector<16x16xf32>
    %c0_1 = arith.constant 0 : index
    %c0_2 = arith.constant 0 : index
    %1 = vector.load %arg2[%c0_1, %c0_2] : memref<16x96xf32, #tpu.memory_space<vmem>>, vector<16x96xf32>
    %cst = arith.constant dense<0.000000e+00> : vector<16x96xf32>
    %2 = tpu.matmul %0, %1, %cst {dimension_numbers = #tpu.dot_dimension_numbers<[1], [0], [0], [1], [0, 0, 1, 1], [], []>} : vector<16x16xf32>, vector<16x96xf32>, vector<16x96xf32> -> vector<16x96xf32>
    %c0_3 = arith.constant 0 : index
    %3 = memref.load %arg4[%c0_3] : memref<1xf32, #tpu.memory_space<smem>>
    %4 = vector.extract_strided_slice %2 {offsets = [0, 0], sizes = [16, 16], strides = [1, 1]} : vector<16x96xf32> to vector<16x16xf32>
    %5 = vector.extract_strided_slice %2 {offsets = [0, 16], sizes = [16, 16], strides = [1, 1]} : vector<16x96xf32> to vector<16x16xf32>
    %6 = vector.extract_strided_slice %2 {offsets = [0, 32], sizes = [16, 16], strides = [1, 1]} : vector<16x96xf32> to vector<16x16xf32>
    %7 = vector.extract_strided_slice %2 {offsets = [0, 48], sizes = [16, 16], strides = [1, 1]} : vector<16x96xf32> to vector<16x16xf32>
    %8 = vector.extract_strided_slice %2 {offsets = [0, 64], sizes = [16, 16], strides = [1, 1]} : vector<16x96xf32> to vector<16x16xf32>
    %9 = vector.extract_strided_slice %2 {offsets = [0, 80], sizes = [16, 16], strides = [1, 1]} : vector<16x96xf32> to vector<16x16xf32>
    %10 = vector.extract_strided_slice %4 {offsets = [0, 0], sizes = [8, 8], strides = [1, 1]} : vector<16x16xf32> to vector<8x8xf32>
    %11 = vector.extract_strided_slice %5 {offsets = [0, 0], sizes = [8, 8], strides = [1, 1]} : vector<16x16xf32> to vector<8x8xf32>
    %12 = vector.extract_strided_slice %6 {offsets = [0, 0], sizes = [8, 8], strides = [1, 1]} : vector<16x16xf32> to vector<8x8xf32>
    %13 = vector.extract_strided_slice %7 {offsets = [0, 0], sizes = [8, 8], strides = [1, 1]} : vector<16x16xf32> to vector<8x8xf32>
    %14 = vector.extract_strided_slice %8 {offsets = [0, 0], sizes = [8, 8], strides = [1, 1]} : vector<16x16xf32> to vector<8x8xf32>
    %15 = vector.extract_strided_slice %9 {offsets = [0, 0], sizes = [8, 8], strides = [1, 1]} : vector<16x16xf32> to vector<8x8xf32>
    %cst_4 = arith.constant dense<0.000000e+00> : vector<8x8xf32>
    %16 = tpu.matmul %10, %12, %cst_4 {dimension_numbers = #tpu.dot_dimension_numbers<[1], [1], [0], [0], [0, 0, 1, 0], [], []>} : vector<8x8xf32>, vector<8x8xf32>, vector<8x8xf32> -> vector<8x8xf32>
    %cst_5 = arith.constant dense<0.000000e+00> : vector<8x8xf32>
    %17 = tpu.matmul %11, %13, %cst_5 {dimension_numbers = #tpu.dot_dimension_numbers<[1], [1], [0], [0], [0, 0, 1, 0], [], []>} : vector<8x8xf32>, vector<8x8xf32>, vector<8x8xf32> -> vector<8x8xf32>
    %18 = arith.addf %16, %17 : vector<8x8xf32>
    %cst_6 = arith.constant dense<0.000000e+00> : vector<8x8xf32>
    %19 = tpu.matmul %11, %12, %cst_6 {dimension_numbers = #tpu.dot_dimension_numbers<[1], [1], [0], [0], [0, 0, 1, 0], [], []>} : vector<8x8xf32>, vector<8x8xf32>, vector<8x8xf32> -> vector<8x8xf32>
    %cst_7 = arith.constant dense<0.000000e+00> : vector<8x8xf32>
    %20 = tpu.matmul %10, %13, %cst_7 {dimension_numbers = #tpu.dot_dimension_numbers<[1], [1], [0], [0], [0, 0, 1, 0], [], []>} : vector<8x8xf32>, vector<8x8xf32>, vector<8x8xf32> -> vector<8x8xf32>
    %21 = arith.subf %19, %20 : vector<8x8xf32>
    %22 = arith.mulf %18, %18 : vector<8x8xf32>
    %23 = arith.mulf %21, %21 : vector<8x8xf32>
    %24 = arith.addf %22, %23 : vector<8x8xf32>
    %25 = math.sqrt %24 : vector<8x8xf32>
    %26 = vector.broadcast %3 : f32 to vector<8x8xf32>
    %27 = arith.mulf %25, %26 : vector<8x8xf32>
    %cst_8 = arith.constant dense<0xFF800000> : vector<8xf32>
    %28 = vector.multi_reduction <maximumf>, %27, %cst_8 [1] : vector<8x8xf32> to vector<8xf32>
    %29 = vector.shape_cast %28 : vector<8xf32> to vector<8x1xf32>
    %30 = vector.broadcast %29 : vector<8x1xf32> to vector<8x8xf32>
    %31 = arith.subf %27, %30 : vector<8x8xf32>
    %32 = math.exp %31 : vector<8x8xf32>
    %cst_9 = arith.constant dense<0.000000e+00> : vector<8xf32>
    %33 = vector.multi_reduction <add>, %32, %cst_9 [1] : vector<8x8xf32> to vector<8xf32>
    %34 = vector.shape_cast %33 : vector<8xf32> to vector<8x1xf32>
    %35 = tpu.reciprocal %34 {approx = true} : vector<8x1xf32> -> vector<8x1xf32>
    %36 = vector.broadcast %35 : vector<8x1xf32> to vector<8x8xf32>
    %37 = arith.mulf %32, %36 : vector<8x8xf32>
    %cst_10 = arith.constant dense<0.000000e+00> : vector<8x8xf32>
    %38 = tpu.matmul %37, %14, %cst_10 {dimension_numbers = #tpu.dot_dimension_numbers<[1], [0], [0], [1], [0, 0, 1, 1], [], []>} : vector<8x8xf32>, vector<8x8xf32>, vector<8x8xf32> -> vector<8x8xf32>
    %c0_11 = arith.constant 0 : index
    %c0_12 = arith.constant 0 : index
    %39 = vector.load %arg6[%c0_11, %c0_12] : memref<16x32xf32, #tpu.memory_space<vmem>>, vector<8x8xf32>
    tpu.vector_store %arg6[%c0_11, %c0_12], %38 {strides = array<i32>} : memref<16x32xf32, #tpu.memory_space<vmem>>, vector<8x8xf32>,
    %cst_13 = arith.constant dense<0.000000e+00> : vector<8x8xf32>
    %40 = tpu.matmul %37, %15, %cst_13 {dimension_numbers = #tpu.dot_dimension_numbers<[1], [0], [0], [1], [0, 0, 1, 1], [], []>} : vector<8x8xf32>, vector<8x8xf32>, vector<8x8xf32> -> vector<8x8xf32>
    %c0_14 = arith.constant 0 : index
    %c16 = arith.constant 16 : index
    %41 = vector.load %arg6[%c0_14, %c16] : memref<16x32xf32, #tpu.memory_space<vmem>>, vector<8x8xf32>
    tpu.vector_store %arg6[%c0_14, %c16], %40 {strides = array<i32>} : memref<16x32xf32, #tpu.memory_space<vmem>>, vector<8x8xf32>,
    %42 = vector.extract_strided_slice %4 {offsets = [0, 8], sizes = [8, 8], strides = [1, 1]} : vector<16x16xf32> to vector<8x8xf32>
    %43 = vector.extract_strided_slice %5 {offsets = [0, 8], sizes = [8, 8], strides = [1, 1]} : vector<16x16xf32> to vector<8x8xf32>
    %44 = vector.extract_strided_slice %6 {offsets = [0, 8], sizes = [8, 8], strides = [1, 1]} : vector<16x16xf32> to vector<8x8xf32>
    %45 = vector.extract_strided_slice %7 {offsets = [0, 8], sizes = [8, 8], strides = [1, 1]} : vector<16x16xf32> to vector<8x8xf32>
    %46 = vector.extract_strided_slice %8 {offsets = [0, 8], sizes = [8, 8], strides = [1, 1]} : vector<16x16xf32> to vector<8x8xf32>
    %47 = vector.extract_strided_slice %9 {offsets = [0, 8], sizes = [8, 8], strides = [1, 1]} : vector<16x16xf32> to vector<8x8xf32>
    %cst_15 = arith.constant dense<0.000000e+00> : vector<8x8xf32>
    %48 = tpu.matmul %42, %44, %cst_15 {dimension_numbers = #tpu.dot_dimension_numbers<[1], [1], [0], [0], [0, 0, 1, 0], [], []>} : vector<8x8xf32>, vector<8x8xf32>, vector<8x8xf32> -> vector<8x8xf32>
    %cst_16 = arith.constant dense<0.000000e+00> : vector<8x8xf32>
    %49 = tpu.matmul %43, %45, %cst_16 {dimension_numbers = #tpu.dot_dimension_numbers<[1], [1], [0], [0], [0, 0, 1, 0], [], []>} : vector<8x8xf32>, vector<8x8xf32>, vector<8x8xf32> -> vector<8x8xf32>
    %50 = arith.addf %48, %49 : vector<8x8xf32>
    %cst_17 = arith.constant dense<0.000000e+00> : vector<8x8xf32>
    %51 = tpu.matmul %43, %44, %cst_17 {dimension_numbers = #tpu.dot_dimension_numbers<[1], [1], [0], [0], [0, 0, 1, 0], [], []>} : vector<8x8xf32>, vector<8x8xf32>, vector<8x8xf32> -> vector<8x8xf32>
    %cst_18 = arith.constant dense<0.000000e+00> : vector<8x8xf32>
    %52 = tpu.matmul %42, %45, %cst_18 {dimension_numbers = #tpu.dot_dimension_numbers<[1], [1], [0], [0], [0, 0, 1, 0], [], []>} : vector<8x8xf32>, vector<8x8xf32>, vector<8x8xf32> -> vector<8x8xf32>
    %53 = arith.subf %51, %52 : vector<8x8xf32>
    %54 = arith.mulf %50, %50 : vector<8x8xf32>
    %55 = arith.mulf %53, %53 : vector<8x8xf32>
    %56 = arith.addf %54, %55 : vector<8x8xf32>
    %57 = math.sqrt %56 : vector<8x8xf32>
    %58 = vector.broadcast %3 : f32 to vector<8x8xf32>
    %59 = arith.mulf %57, %58 : vector<8x8xf32>
    %cst_19 = arith.constant dense<0xFF800000> : vector<8xf32>
    %60 = vector.multi_reduction <maximumf>, %59, %cst_19 [1] : vector<8x8xf32> to vector<8xf32>
    %61 = vector.shape_cast %60 : vector<8xf32> to vector<8x1xf32>
    %62 = vector.broadcast %61 : vector<8x1xf32> to vector<8x8xf32>
    %63 = arith.subf %59, %62 : vector<8x8xf32>
    %64 = math.exp %63 : vector<8x8xf32>
    %cst_20 = arith.constant dense<0.000000e+00> : vector<8xf32>
    %65 = vector.multi_reduction <add>, %64, %cst_20 [1] : vector<8x8xf32> to vector<8xf32>
    %66 = vector.shape_cast %65 : vector<8xf32> to vector<8x1xf32>
    %67 = tpu.reciprocal %66 {approx = true} : vector<8x1xf32> -> vector<8x1xf32>
    %68 = vector.broadcast %67 : vector<8x1xf32> to vector<8x8xf32>
    %69 = arith.mulf %64, %68 : vector<8x8xf32>
    %cst_21 = arith.constant dense<0.000000e+00> : vector<8x8xf32>
    %70 = tpu.matmul %69, %46, %cst_21 {dimension_numbers = #tpu.dot_dimension_numbers<[1], [0], [0], [1], [0, 0, 1, 1], [], []>} : vector<8x8xf32>, vector<8x8xf32>, vector<8x8xf32> -> vector<8x8xf32>
    %c0_22 = arith.constant 0 : index
    %c8 = arith.constant 8 : index
    %71 = vector.load %arg6[%c0_22, %c8] : memref<16x32xf32, #tpu.memory_space<vmem>>, vector<8x8xf32>
    tpu.vector_store %arg6[%c0_22, %c8], %70 {strides = array<i32>} : memref<16x32xf32, #tpu.memory_space<vmem>>, vector<8x8xf32>,
    %cst_23 = arith.constant dense<0.000000e+00> : vector<8x8xf32>
    %72 = tpu.matmul %69, %47, %cst_23 {dimension_numbers = #tpu.dot_dimension_numbers<[1], [0], [0], [1], [0, 0, 1, 1], [], []>} : vector<8x8xf32>, vector<8x8xf32>, vector<8x8xf32> -> vector<8x8xf32>
    %c0_24 = arith.constant 0 : index
    %c24 = arith.constant 24 : index
    %73 = vector.load %arg6[%c0_24, %c24] : memref<16x32xf32, #tpu.memory_space<vmem>>, vector<8x8xf32>
    tpu.vector_store %arg6[%c0_24, %c24], %72 {strides = array<i32>} : memref<16x32xf32, #tpu.memory_space<vmem>>, vector<8x8xf32>,
    %74 = vector.extract_strided_slice %4 {offsets = [8, 0], sizes = [8, 8], strides = [1, 1]} : vector<16x16xf32> to vector<8x8xf32>
    %75 = vector.extract_strided_slice %5 {offsets = [8, 0], sizes = [8, 8], strides = [1, 1]} : vector<16x16xf32> to vector<8x8xf32>
    %76 = vector.extract_strided_slice %6 {offsets = [8, 0], sizes = [8, 8], strides = [1, 1]} : vector<16x16xf32> to vector<8x8xf32>
    %77 = vector.extract_strided_slice %7 {offsets = [8, 0], sizes = [8, 8], strides = [1, 1]} : vector<16x16xf32> to vector<8x8xf32>
    %78 = vector.extract_strided_slice %8 {offsets = [8, 0], sizes = [8, 8], strides = [1, 1]} : vector<16x16xf32> to vector<8x8xf32>
    %79 = vector.extract_strided_slice %9 {offsets = [8, 0], sizes = [8, 8], strides = [1, 1]} : vector<16x16xf32> to vector<8x8xf32>
    %cst_25 = arith.constant dense<0.000000e+00> : vector<8x8xf32>
    %80 = tpu.matmul %74, %76, %cst_25 {dimension_numbers = #tpu.dot_dimension_numbers<[1], [1], [0], [0], [0, 0, 1, 0], [], []>} : vector<8x8xf32>, vector<8x8xf32>, vector<8x8xf32> -> vector<8x8xf32>
    %cst_26 = arith.constant dense<0.000000e+00> : vector<8x8xf32>
    %81 = tpu.matmul %75, %77, %cst_26 {dimension_numbers = #tpu.dot_dimension_numbers<[1], [1], [0], [0], [0, 0, 1, 0], [], []>} : vector<8x8xf32>, vector<8x8xf32>, vector<8x8xf32> -> vector<8x8xf32>
    %82 = arith.addf %80, %81 : vector<8x8xf32>
    %cst_27 = arith.constant dense<0.000000e+00> : vector<8x8xf32>
    %83 = tpu.matmul %75, %76, %cst_27 {dimension_numbers = #tpu.dot_dimension_numbers<[1], [1], [0], [0], [0, 0, 1, 0], [], []>} : vector<8x8xf32>, vector<8x8xf32>, vector<8x8xf32> -> vector<8x8xf32>
    %cst_28 = arith.constant dense<0.000000e+00> : vector<8x8xf32>
    %84 = tpu.matmul %74, %77, %cst_28 {dimension_numbers = #tpu.dot_dimension_numbers<[1], [1], [0], [0], [0, 0, 1, 0], [], []>} : vector<8x8xf32>, vector<8x8xf32>, vector<8x8xf32> -> vector<8x8xf32>
    %85 = arith.subf %83, %84 : vector<8x8xf32>
    %86 = arith.mulf %82, %82 : vector<8x8xf32>
    %87 = arith.mulf %85, %85 : vector<8x8xf32>
    %88 = arith.addf %86, %87 : vector<8x8xf32>
    %89 = math.sqrt %88 : vector<8x8xf32>
    %90 = vector.broadcast %3 : f32 to vector<8x8xf32>
    %91 = arith.mulf %89, %90 : vector<8x8xf32>
    %cst_29 = arith.constant dense<0xFF800000> : vector<8xf32>
    %92 = vector.multi_reduction <maximumf>, %91, %cst_29 [1] : vector<8x8xf32> to vector<8xf32>
    %93 = vector.shape_cast %92 : vector<8xf32> to vector<8x1xf32>
    %94 = vector.broadcast %93 : vector<8x1xf32> to vector<8x8xf32>
    %95 = arith.subf %91, %94 : vector<8x8xf32>
    %96 = math.exp %95 : vector<8x8xf32>
    %cst_30 = arith.constant dense<0.000000e+00> : vector<8xf32>
    %97 = vector.multi_reduction <add>, %96, %cst_30 [1] : vector<8x8xf32> to vector<8xf32>
    %98 = vector.shape_cast %97 : vector<8xf32> to vector<8x1xf32>
    %99 = tpu.reciprocal %98 {approx = true} : vector<8x1xf32> -> vector<8x1xf32>
    %100 = vector.broadcast %99 : vector<8x1xf32> to vector<8x8xf32>
    %101 = arith.mulf %96, %100 : vector<8x8xf32>
    %cst_31 = arith.constant dense<0.000000e+00> : vector<8x8xf32>
    %102 = tpu.matmul %101, %78, %cst_31 {dimension_numbers = #tpu.dot_dimension_numbers<[1], [0], [0], [1], [0, 0, 1, 1], [], []>} : vector<8x8xf32>, vector<8x8xf32>, vector<8x8xf32> -> vector<8x8xf32>
    %c8_32 = arith.constant 8 : index
    %c0_33 = arith.constant 0 : index
    %103 = vector.load %arg6[%c8_32, %c0_33] : memref<16x32xf32, #tpu.memory_space<vmem>>, vector<8x8xf32>
    tpu.vector_store %arg6[%c8_32, %c0_33], %102 {strides = array<i32>} : memref<16x32xf32, #tpu.memory_space<vmem>>, vector<8x8xf32>,
    %cst_34 = arith.constant dense<0.000000e+00> : vector<8x8xf32>
    %104 = tpu.matmul %101, %79, %cst_34 {dimension_numbers = #tpu.dot_dimension_numbers<[1], [0], [0], [1], [0, 0, 1, 1], [], []>} : vector<8x8xf32>, vector<8x8xf32>, vector<8x8xf32> -> vector<8x8xf32>
    %c8_35 = arith.constant 8 : index
    %c16_36 = arith.constant 16 : index
    %105 = vector.load %arg6[%c8_35, %c16_36] : memref<16x32xf32, #tpu.memory_space<vmem>>, vector<8x8xf32>
    tpu.vector_store %arg6[%c8_35, %c16_36], %104 {strides = array<i32>} : memref<16x32xf32, #tpu.memory_space<vmem>>, vector<8x8xf32>,
    %106 = vector.extract_strided_slice %4 {offsets = [8, 8], sizes = [8, 8], strides = [1, 1]} : vector<16x16xf32> to vector<8x8xf32>
    %107 = vector.extract_strided_slice %5 {offsets = [8, 8], sizes = [8, 8], strides = [1, 1]} : vector<16x16xf32> to vector<8x8xf32>
    %108 = vector.extract_strided_slice %6 {offsets = [8, 8], sizes = [8, 8], strides = [1, 1]} : vector<16x16xf32> to vector<8x8xf32>
    %109 = vector.extract_strided_slice %7 {offsets = [8, 8], sizes = [8, 8], strides = [1, 1]} : vector<16x16xf32> to vector<8x8xf32>
    %110 = vector.extract_strided_slice %8 {offsets = [8, 8], sizes = [8, 8], strides = [1, 1]} : vector<16x16xf32> to vector<8x8xf32>
    %111 = vector.extract_strided_slice %9 {offsets = [8, 8], sizes = [8, 8], strides = [1, 1]} : vector<16x16xf32> to vector<8x8xf32>
    %cst_37 = arith.constant dense<0.000000e+00> : vector<8x8xf32>
    %112 = tpu.matmul %106, %108, %cst_37 {dimension_numbers = #tpu.dot_dimension_numbers<[1], [1], [0], [0], [0, 0, 1, 0], [], []>} : vector<8x8xf32>, vector<8x8xf32>, vector<8x8xf32> -> vector<8x8xf32>
    %cst_38 = arith.constant dense<0.000000e+00> : vector<8x8xf32>
    %113 = tpu.matmul %107, %109, %cst_38 {dimension_numbers = #tpu.dot_dimension_numbers<[1], [1], [0], [0], [0, 0, 1, 0], [], []>} : vector<8x8xf32>, vector<8x8xf32>, vector<8x8xf32> -> vector<8x8xf32>
    %114 = arith.addf %112, %113 : vector<8x8xf32>
    %cst_39 = arith.constant dense<0.000000e+00> : vector<8x8xf32>
    %115 = tpu.matmul %107, %108, %cst_39 {dimension_numbers = #tpu.dot_dimension_numbers<[1], [1], [0], [0], [0, 0, 1, 0], [], []>} : vector<8x8xf32>, vector<8x8xf32>, vector<8x8xf32> -> vector<8x8xf32>
    %cst_40 = arith.constant dense<0.000000e+00> : vector<8x8xf32>
    %116 = tpu.matmul %106, %109, %cst_40 {dimension_numbers = #tpu.dot_dimension_numbers<[1], [1], [0], [0], [0, 0, 1, 0], [], []>} : vector<8x8xf32>, vector<8x8xf32>, vector<8x8xf32> -> vector<8x8xf32>
    %117 = arith.subf %115, %116 : vector<8x8xf32>
    %118 = arith.mulf %114, %114 : vector<8x8xf32>
    %119 = arith.mulf %117, %117 : vector<8x8xf32>
    %120 = arith.addf %118, %119 : vector<8x8xf32>
    %121 = math.sqrt %120 : vector<8x8xf32>
    %122 = vector.broadcast %3 : f32 to vector<8x8xf32>
    %123 = arith.mulf %121, %122 : vector<8x8xf32>
    %cst_41 = arith.constant dense<0xFF800000> : vector<8xf32>
    %124 = vector.multi_reduction <maximumf>, %123, %cst_41 [1] : vector<8x8xf32> to vector<8xf32>
    %125 = vector.shape_cast %124 : vector<8xf32> to vector<8x1xf32>
    %126 = vector.broadcast %125 : vector<8x1xf32> to vector<8x8xf32>
    %127 = arith.subf %123, %126 : vector<8x8xf32>
    %128 = math.exp %127 : vector<8x8xf32>
    %cst_42 = arith.constant dense<0.000000e+00> : vector<8xf32>
    %129 = vector.multi_reduction <add>, %128, %cst_42 [1] : vector<8x8xf32> to vector<8xf32>
    %130 = vector.shape_cast %129 : vector<8xf32> to vector<8x1xf32>
    %131 = tpu.reciprocal %130 {approx = true} : vector<8x1xf32> -> vector<8x1xf32>
    %132 = vector.broadcast %131 : vector<8x1xf32> to vector<8x8xf32>
    %133 = arith.mulf %128, %132 : vector<8x8xf32>
    %cst_43 = arith.constant dense<0.000000e+00> : vector<8x8xf32>
    %134 = tpu.matmul %133, %110, %cst_43 {dimension_numbers = #tpu.dot_dimension_numbers<[1], [0], [0], [1], [0, 0, 1, 1], [], []>} : vector<8x8xf32>, vector<8x8xf32>, vector<8x8xf32> -> vector<8x8xf32>
    %c8_44 = arith.constant 8 : index
    %c8_45 = arith.constant 8 : index
    %135 = vector.load %arg6[%c8_44, %c8_45] : memref<16x32xf32, #tpu.memory_space<vmem>>, vector<8x8xf32>
    tpu.vector_store %arg6[%c8_44, %c8_45], %134 {strides = array<i32>} : memref<16x32xf32, #tpu.memory_space<vmem>>, vector<8x8xf32>,
    %cst_46 = arith.constant dense<0.000000e+00> : vector<8x8xf32>
    %136 = tpu.matmul %133, %111, %cst_46 {dimension_numbers = #tpu.dot_dimension_numbers<[1], [0], [0], [1], [0, 0, 1, 1], [], []>} : vector<8x8xf32>, vector<8x8xf32>, vector<8x8xf32> -> vector<8x8xf32>
    %c8_47 = arith.constant 8 : index
    %c24_48 = arith.constant 24 : index
    %137 = vector.load %arg6[%c8_47, %c24_48] : memref<16x32xf32, #tpu.memory_space<vmem>>, vector<8x8xf32>
    tpu.vector_store %arg6[%c8_47, %c24_48], %136 {strides = array<i32>} : memref<16x32xf32, #tpu.memory_space<vmem>>, vector<8x8xf32>,
    %c0_49 = arith.constant 0 : index
    %c0_50 = arith.constant 0 : index
    %138 = vector.load %arg6[%c0_49, %c0_50] : memref<16x32xf32, #tpu.memory_space<vmem>>, vector<16x32xf32>
    %c0_51 = arith.constant 0 : index
    %c0_52 = arith.constant 0 : index
    %139 = vector.load %arg3[%c0_51, %c0_52] : memref<32x16xf32, #tpu.memory_space<vmem>>, vector<32x16xf32>
    %cst_53 = arith.constant dense<0.000000e+00> : vector<16x16xf32>
    %140 = tpu.matmul %138, %139, %cst_53 {dimension_numbers = #tpu.dot_dimension_numbers<[1], [0], [0], [1], [0, 0, 1, 1], [], []>} : vector<16x32xf32>, vector<32x16xf32>, vector<16x16xf32> -> vector<16x16xf32>
    %c0_54 = arith.constant 0 : index
    %c0_55 = arith.constant 0 : index
    %141 = vector.load %arg5[%c0_54, %c0_55] : memref<16x16xf32, #tpu.memory_space<vmem>>, vector<16x16xf32>
    tpu.vector_store %arg5[%c0_54, %c0_55], %140 {strides = array<i32>} : memref<16x16xf32, #tpu.memory_space<vmem>>, vector<16x16xf32>,
    return
  }
  func.func @transform_0(%arg0: i32) -> (i32, i32) {
    %c0_i32 = arith.constant 0 : i32
    %c0_i32_0 = arith.constant 0 : i32
    %c0_i32_1 = arith.constant 0 : i32
    return %c0_i32, %c0_i32_0 : i32, i32
  }
  func.func @transform_1(%arg0: i32) -> (i32, i32) {
    %c0_i32 = arith.constant 0 : i32
    %c0_i32_0 = arith.constant 0 : i32
    %c0_i32_1 = arith.constant 0 : i32
    return %c0_i32, %c0_i32_0 : i32, i32
  }
  func.func @transform_2(%arg0: i32) -> (i32, i32) {
    %c0_i32 = arith.constant 0 : i32
    %c0_i32_0 = arith.constant 0 : i32
    %c0_i32_1 = arith.constant 0 : i32
    return %c0_i32, %c0_i32_0 : i32, i32
  }
  func.func @transform_3(%arg0: i32) -> i32 {
    %c0_i32 = arith.constant 0 : i32
    %c0_i32_0 = arith.constant 0 : i32
    return %c0_i32 : i32
  }
  func.func @transform_4(%arg0: i32) -> (i32, i32) {
    %c0_i32 = arith.constant 0 : i32
    %c0_i32_0 = arith.constant 0 : i32
    %c0_i32_1 = arith.constant 0 : i32
    return %c0_i32, %c0_i32_0 : i32, i32
  }
}

</mosaic_0001>

<bundles_post_ra>
// kernel: tpu_custom_call.1
= control target key start
LH: loop header
LB: loop body
LE: loop exit
PB: predicated region body
PF: predicated region fallthrough
CT: control target
= control target key end

     0   :  { %vm23_vm0 = vcmask 130048   ;;  %s1151_s0 = inlined_call_operand.vmem [shape: f32[16,16], index: 0, kind: input, shape index: {}]   ;;  %s1152_s1 = inlined_call_operand.vmem [shape: f32[16,96], index: 1, kind: input, shape index: {}]   ;;  %s1153_s2 = inlined_call_operand.vmem [shape: f32[32,16], index: 2, kind: input, shape index: {}]   ;;  %s1154_s3 = inlined_call_operand.<no memory space> [shape: f32[1], index: 3, kind: input, shape index: {}]   ;;  %s1155_s4 = inlined_call_operand.hbm [shape: f32[16,16], index: 4, kind: output, shape index: {}]  }
   0x1   :  { %v22_v0 = vld [vmem:[%s1152_s1 + $0x8] sm:$0xff]  ;;  %v21_v1 = vld [vmem:[%s1152_s1] sm:$0xff] }
   0x2   :  { %44 = vmatpush.msra.mxu0 %v22_v0  ;;  %v19_v2 = vld [vmem:[%s1151_s0] sm:$0xff] }
   0x3   :  { %10 = vsyncpa [#allocation5], 0  ;;  %s947_s21 = smov 64   ;;  %s948_s22 = smov 112   ;;  %vm59_vm1 = vcmask 64512   ;;  %v1034_v29 = vstv %s1154_s3  ;;  %v20_v34 = vld [vmem:[%s1151_s0 + $0x8] sm:$0xff] }
   0x4   :  { %45 = vmatpush.msra.mxu0 %v21_v1  ;;  %s949_s1 = smov 96   ;;  %s950_s23 = smov 80   ;;  %vm233_vm8 = vcmask 195712   ;;  %vm389_vm9 = vcmask 130112   ;;  %vm418_vm12 = vcmask 261312   ;;  %vm787_vm13 = vcmask 261120  }
   0x5   :  { %837 = vmatmul.msk.f32.vlgmr.msra.gmra.mxu0 %vm23_vm0, %v19_v2  ;;  %s951_s24 = smov 48   ;;  %s952_s25 = smov 72  }
   0x6   :  { %s953_s26 = smov 88   ;;  %s954_s27 = smov 120  }
   0x7   :  { %s955_s30 = smov 56   ;;  %s956_s5 = smov 40  }
   0x8   :  { %s957_s3 = smov 104   ;;  %s958_s0 = smov 16  }
   0x9   :  { %s959_s8 = smov 8   ;;  %s960_s9 = smov 24  }
   0xd   :  { %838 = vmatmul.msk.f32.gmra.mxu0 %vm23_vm0, %v20_v34 }
  0x82   :  { %v998_v3 = vpop.f32.mrf.mxu0 }
  0x83   :  { %179 = vrot.lane.b32.xlu2 %v998_v3, %s947_s21  ;;  %55 = vrot.lane.b32.xlu1 %v998_v3, %s948_s22 }
  0x84   :  { %84 = vrot.lane.b32.xlu0 %v998_v3, %s949_s1 }
  0x8a   :  { %v1049_v42 = vpop.f32.mrf.mxu0 }
  0x8c   :  { %57 = vrot.lane.b32.xlu0 %v998_v3, %s950_s23 }
  0x94   :  { %206 = vrot.lane.b32.xlu0 %v998_v3, %s951_s24 }
  0x9c   :  { %237 = vrot.lane.b32.xlu0 %v998_v3, %s952_s25 }
  0xa4   :  { %265 = vrot.lane.b32.xlu0 %v998_v3, %s953_s26 }
  0xac   :  { %263 = vrot.lane.b32.xlu0 %v998_v3, %s954_s27 }
  0xdd   :  { %v180_v4 = vpop.permute.xlu2 %179 }
  0xde   :  { %200 = vmatpush.msra.mxu2 %v180_v4 }
  0xf5   :  { %v56_v7 = vpop.permute.xlu1 %55 }
  0xf6   :  { %v85_v5 = vpop.permute.xlu0 %84 }
  0xf7   :  { %841 = vmatpush.xpose.msk.msra.mxu3 %vm59_vm1, %v85_v5 }
  0xfa   :  { %842 = vmatmul.msk.f32.vlgmr.msra.gmra.mxu3 %vm59_vm1, %v998_v3 }
  0xfb   :  { %843 = vmatpush.xpose.msk.msrb.mxu3 %vm59_vm1, %v85_v5 }
  0xfe   :  { %v58_v6 = vpop.permute.xlu0 %57 }
  0xff   :  { %839 = vmatpush.xpose.msk.msra.mxu1 %vm59_vm1, %v58_v6 }
 0x102   :  { %840 = vmatmul.msk.f32.vlgmr.msra.gmra.mxu1 %vm59_vm1, %v56_v7  ;;  %844 = vmatmul.msk.f32.vlgmr.msrb.gmra.mxu3 %vm59_vm1, %v56_v7 }
 0x103   :  { %845 = vmatpush.xpose.msk.msrb.mxu1 %vm59_vm1, %v58_v6 }
 0x106   :  { %v207_v8 = vpop.permute.xlu0 %206 }
 0x107   :  { %224 = vmatpush.msra.mxu3 %v207_v8 }
 0x10a   :  { %846 = vmatmul.msk.f32.vlgmr.msrb.gmra.mxu1 %vm59_vm1, %v998_v3 }
 0x10e   :  { %v238_v9 = vpop.permute.xlu0 %237 }
 0x10f   :  { %849 = vmatpush.xpose.msk.msrb.mxu0 %vm59_vm1, %v238_v9  ;;  %855 = vmatpush.xpose.msk.msrb.mxu3 %vm59_vm1, %v238_v9 }
 0x116   :  { %v266_v10 = vpop.permute.xlu0 %265 }
 0x117   :  { %851 = vmatpush.xpose.msk.msra.mxu1 %vm59_vm1, %v266_v10  ;;  %853 = vmatpush.xpose.msk.msrb.mxu2 %vm59_vm1, %v266_v10 }
 0x11e   :  { %v264_v11 = vpop.permute.xlu0 %263 }
 0x11f   :  { %852 = vmatmul.msk.f32.vlgmr.msra.gmra.mxu1 %vm59_vm1, %v264_v11 }
 0x17d   :  { %v107_v12 = vpop.f32.mrf.mxu3 }
 0x17f   :  { %v81_v13 = vpop.f32.mrf.mxu1 }
 0x180   :  { %v108_v14 = vadd.f32 %v107_v12, %v81_v13 }
 0x182   :  { %v151_v18 = vmul.f32 %v108_v14, %v108_v14 }
 0x185   :  { %v127_v15 = vpop.f32.mrf.mxu3 }
 0x187   :  { %v147_v16 = vpop.f32.mrf.mxu1 }
 0x188   :  { %v150_v17 = vsub.f32 %v127_v15, %v147_v16 }
 0x18a   :  { %v152_v19 = vmul.f32 %v150_v17, %v150_v17 }
 0x18c   :  { %v153_v20 = vadd.f32 %v152_v19, %v151_v18 }
 0x18e   :  { %897 = vrsqrt.f32 %v153_v20  ;;  %vm161_vm2 = vcmp.eq.f32.partialorder %v153_v20, inf  ;;  %v164_v28 = vand.u32 2147483648, %v153_v20  ;;  %vm163_vm3 = vcmp.eq.f32.partialorder %v153_v20, 0.0 }
 0x194   :  { %v898_v21 = vpop.eup %897 }
 0x195   :  { %v155_v22 = vmul.f32 %v898_v21, %v153_v20 }
 0x197   :  { %v156_v23 = vmul.f32 %v898_v21, %v155_v22 }
 0x199   :  { %v157_v24 = vmul.f32 0.5, %v156_v23 }
 0x19b   :  { %v158_v25 = vsub.f32 1.5, %v157_v24 }
 0x19c   :  { %v288_v51 = vpop.f32.mrf.mxu1 }
 0x19d   :  { %v159_v26 = vmul.f32 %v898_v21, %v158_v25 }
 0x19f   :  { %v160_v27 = vmul.f32 %v159_v26, %v153_v20 }
 0x1a1   :  { %v162_v30 = vsel %vm161_vm2, %v153_v20, %v160_v27 }
 0x1a2   :  { %v165_v31 = vsel %vm163_vm3, %v164_v28, %v162_v30 }
 0x1a3   :  { %v167_v32 = vmul.f32 %v1034_v29, %v165_v31 }
 0x1a5   :  { %v168_v33 = vsel %vm59_vm1, %v167_v32, -inf }
 0x1a6   :  { %169 = vmax.xlane.f32.xlu1 %v168_v33 }
 0x1bf   :  { %359 = vrot.lane.b32.xlu1 %v998_v3, %s955_s30 }
 0x1c7   :  { %391 = vrot.lane.b32.xlu1 %v998_v3, %s956_s5 }
 0x1cf   :  { %449 = vrot.lane.b32.xlu1 %v1049_v42, %s949_s1 }
 0x219   :  { %v170_v35 = vpop.xlane.xlu1 %169 }
 0x21a   :  { %v171_v36 = vsub.f32 %v167_v32, %v170_v35 }
 0x21c   :  { %v172_v37 = vmul.f32 1.442695, %v171_v36 }
 0x21e   :  { %899 = vpow2.f32 %v172_v37 }
 0x224   :  { %v900_v38 = vpop.eup %899 }
 0x225   :  { %v174_v39 = vsel %vm59_vm1, %v900_v38, 0.0 }
 0x226   :  { %175 = vadd.xlane.f32.xlu2 %v174_v39 }
 0x231   :  { %v360_v40 = vpop.permute.xlu1 %359 }
 0x232   :  { %380 = vmatpush.msra.mxu0 %v360_v40 }
 0x239   :  { %v392_v41 = vpop.permute.xlu1 %391 }
 0x23a   :  { %409 = vmatpush.msrb.mxu1 %v392_v41 }
 0x23e   :  { %235 = vrot.lane.b32.xlu2 %v998_v3, %s957_s3 }
 0x241   :  { %v450_v47 = vpop.permute.xlu1 %449 }
 0x299   :  { %v176_v43 = vpop.xlane.xlu2 %175 }
 0x29a   :  { %901 = vrcp.f32 %v176_v43 }
 0x2a0   :  { %v902_v44 = vpop.eup %901 }
 0x2a1   :  { %v236_v45 = vpop.permute.xlu2 %235  ;;  %v178_v46 = vmul.f32 %v902_v44, %v900_v38 }
 0x2a2   :  { %850 = vmatmul.msk.f32.vlgmr.msrb.gmra.mxu0 %vm59_vm1, %v236_v45 }
 0x2a3   :  { %847 = vmatmul.msk.f32.vlgmr.msra.gmra.mxu2 %vm59_vm1, %v178_v46  ;;  %848 = vmatmul.msk.f32.vlgmr.msra.gmra.mxu3 %vm59_vm1, %v178_v46 }
 0x2a4   :  { %861 = vmatpush.xpose.msk.msra.mxu3 %vm59_vm1, %v450_v47  ;;  %863 = vmatpush.xpose.msk.msrb.mxu0 %vm59_vm1, %v450_v47 }
 0x2ab   :  { %854 = vmatmul.msk.f32.vlgmr.msrb.gmra.mxu2 %vm59_vm1, %v236_v45  ;;  %856 = vmatmul.msk.f32.vlgmr.msrb.gmra.mxu3 %vm59_vm1, %v264_v11 }
 0x2b3   :  { %862 = vmatmul.msk.f32.vlgmr.msra.gmra.mxu3 %vm59_vm1, %v1049_v42 }
 0x31f   :  { %v260_v50 = vpop.f32.mrf.mxu0 }
 0x320   :  { %v289_v52 = vadd.f32 %v288_v51, %v260_v50 }
 0x322   :  { %v332_v56 = vmul.f32 %v289_v52, %v289_v52 }
 0x326   :  { %v202_v48 = vpop.f32.mrf.mxu2  ;;  %v1062_v49 = vpop.f32.mrf.mxu3 }
 0x327   :  { %205 = vst.msk [vmem:[#allocation2] sm:$0xff] %vm59_vm1, %v202_v48 }
 0x32e   :  { %v308_v53 = vpop.f32.mrf.mxu2  ;;  %v328_v54 = vpop.f32.mrf.mxu3 }
 0x32f   :  { %v331_v55 = vsub.f32 %v308_v53, %v328_v54 }
 0x331   :  { %v333_v57 = vmul.f32 %v331_v55, %v331_v55 }
 0x333   :  { %v334_v58 = vadd.f32 %v333_v57, %v332_v56 }
 0x335   :  { %903 = vrsqrt.f32 %v334_v58  ;;  %vm342_vm4 = vcmp.eq.f32.partialorder %v334_v58, inf  ;;  %v345_v2 = vand.u32 2147483648, %v334_v58  ;;  %vm344_vm5 = vcmp.eq.f32.partialorder %v334_v58, 0.0 }
 0x336   :  { %v472_v26 = vpop.f32.mrf.mxu3 }
 0x33b   :  { %v904_v59 = vpop.eup %903 }
 0x33c   :  { %v336_v60 = vmul.f32 %v904_v59, %v334_v58 }
 0x33e   :  { %v337_v61 = vmul.f32 %v904_v59, %v336_v60 }
 0x340   :  { %v338_v62 = vmul.f32 0.5, %v337_v61 }
 0x342   :  { %v339_v63 = vsub.f32 1.5, %v338_v62 }
 0x344   :  { %v340_v0 = vmul.f32 %v904_v59, %v339_v63 }
 0x346   :  { %v341_v1 = vmul.f32 %v340_v0, %v334_v58 }
 0x348   :  { %v343_v3 = vsel %vm342_vm4, %v334_v58, %v341_v1 }
 0x349   :  { %v346_v4 = vsel %vm344_vm5, %v345_v2, %v343_v3 }
 0x34a   :  { %v347_v5 = vmul.f32 %v346_v4, %v1034_v29 }
 0x34c   :  { %v348_v6 = vsel %vm59_vm1, %v347_v5, -inf }
 0x34d   :  { %349 = vmax.xlane.f32.xlu2 %v348_v6 }
 0x365   :  { %423 = vrot.lane.b32.xlu2 %v1049_v42, %s950_s23 }
 0x3c0   :  { %v350_v7 = vpop.xlane.xlu2 %349 }
 0x3c1   :  { %v351_v8 = vsub.f32 %v347_v5, %v350_v7 }
 0x3c3   :  { %v352_v9 = vmul.f32 1.442695, %v351_v8 }
 0x3c5   :  { %905 = vpow2.f32 %v352_v9 }
 0x3c8   :  { %v424_v10 = vpop.permute.xlu2 %423 }
 0x3c9   :  { %859 = vmatpush.xpose.msk.msra.mxu2 %vm59_vm1, %v424_v10  ;;  %865 = vmatpush.xpose.msk.msra.mxu1 %vm59_vm1, %v424_v10 }
 0x3cb   :  { %v906_v11 = vpop.eup %905 }
 0x3cc   :  { %v354_v12 = vsel %vm59_vm1, %v906_v11, 0.0 }
 0x3cd   :  { %355 = vadd.xlane.f32.xlu0 %v354_v12 }
 0x3e1   :  { %421 = vrot.lane.b32.xlu0 %v1049_v42, %s948_s22  ;;  %s962_s22 = smov 128  }
 0x3e9   :  { %543 = vrot.lane.b32.xlu0 %v1049_v42, %s947_s21  ;;  %s825_s21 = sshll.u32 %s1155_s4, 4  ;;  %s826_s21 = int_to_ptr.hbm [resolvable:$true] %s825_s21 }
 0x3f1   :  { %570 = vrot.lane.b32.xlu0 %v1049_v42, %s951_s24 }
 0x3f9   :  { %600 = vrot.lane.b32.xlu0 %v1049_v42, %s952_s25 }
 0x401   :  { %598 = vrot.lane.b32.xlu0 %v1049_v42, %s957_s3 }
 0x409   :  { %626 = vrot.lane.b32.xlu0 %v1049_v42, %s954_s27 }
 0x440   :  { %v356_v13 = vpop.xlane.xlu0 %355 }
 0x441   :  { %907 = vrcp.f32 %v356_v13 }
 0x447   :  { %v908_v14 = vpop.eup %907 }
 0x448   :  { %v358_v15 = vmul.f32 %v908_v14, %v906_v11 }
 0x44a   :  { %857 = vmatmul.msk.f32.vlgmr.msra.gmra.mxu0 %vm59_vm1, %v358_v15  ;;  %858 = vmatmul.msk.f32.vlgmr.msrb.gmra.mxu1 %vm59_vm1, %v358_v15 }
 0x452   :  { %866 = vmatmul.msk.f32.vlgmr.msra.gmra.mxu1 %vm59_vm1, %v1049_v42 }
 0x453   :  { %v422_v16 = vpop.permute.xlu0 %421 }
 0x454   :  { %860 = vmatmul.msk.f32.vlgmr.msra.gmra.mxu2 %vm59_vm1, %v422_v16  ;;  %864 = vmatmul.msk.f32.vlgmr.msrb.gmra.mxu0 %vm59_vm1, %v422_v16 }
 0x45b   :  { %v544_v17 = vpop.permute.xlu0 %543 }
 0x45c   :  { %564 = vmatpush.msrb.mxu2 %v544_v17 }
 0x463   :  { %v571_v18 = vpop.permute.xlu0 %570 }
 0x464   :  { %588 = vmatpush.msrb.mxu3 %v571_v18 }
 0x46b   :  { %v601_v19 = vpop.permute.xlu0 %600 }
 0x46c   :  { %869 = vmatpush.xpose.msk.msra.mxu0 %vm59_vm1, %v601_v19  ;;  %875 = vmatpush.xpose.msk.msra.mxu3 %vm59_vm1, %v601_v19  ;;  %v786_v19 = vld [vmem:[%s1153_s2 + $0x18] sm:$0xff] }
 0x473   :  { %v599_v20 = vpop.permute.xlu0 %598 }
 0x474   :  { %870 = vmatmul.msk.f32.vlgmr.msra.gmra.mxu0 %vm59_vm1, %v599_v20 }
 0x47b   :  { %v627_v53 = vpop.permute.xlu0 %626 }
 0x4c7   :  { %v382_v21 = vpop.f32.mrf.mxu0  ;;  %v1093_v22 = vpop.f32.mrf.mxu1 }
 0x4cf   :  { %v512_v24 = vpop.f32.mrf.mxu1 }
 0x4d1   :  { %v492_v23 = vpop.f32.mrf.mxu0 }
 0x4d2   :  { %v515_v25 = vsub.f32 %v492_v23, %v512_v24 }
 0x4d4   :  { %v517_v30 = vmul.f32 %v515_v25, %v515_v25 }
 0x4d7   :  { %v446_v27 = vpop.f32.mrf.mxu2 }
 0x4d8   :  { %v473_v28 = vadd.f32 %v472_v26, %v446_v27 }
 0x4da   :  { %v516_v31 = vmul.f32 %v473_v28, %v473_v28 }
 0x4dc   :  { %v518_v32 = vadd.f32 %v517_v30, %v516_v31 }
 0x4de   :  { %909 = vrsqrt.f32 %v518_v32  ;;  %vm526_vm6 = vcmp.eq.f32.partialorder %v518_v32, inf  ;;  %v529_v40 = vand.u32 2147483648, %v518_v32  ;;  %vm528_vm7 = vcmp.eq.f32.partialorder %v518_v32, 0.0 }
 0x4e4   :  { %v910_v33 = vpop.eup %909 }
 0x4e5   :  { %v520_v34 = vmul.f32 %v910_v33, %v518_v32 }
 0x4e7   :  { %v521_v35 = vmul.f32 %v910_v33, %v520_v34 }
 0x4e9   :  { %v522_v36 = vmul.f32 0.5, %v521_v35 }
 0x4eb   :  { %v523_v37 = vsub.f32 1.5, %v522_v36 }
 0x4ed   :  { %v524_v38 = vmul.f32 %v910_v33, %v523_v37 }
 0x4ef   :  { %v525_v39 = vmul.f32 %v524_v38, %v518_v32 }
 0x4f1   :  { %v527_v41 = vsel %vm526_vm6, %v518_v32, %v525_v39  ;;  %v623_v62 = vpop.f32.mrf.mxu0 }
 0x4f2   :  { %v530_v43 = vsel %vm528_vm7, %v529_v40, %v527_v41 }
 0x4f3   :  { %v531_v44 = vmul.f32 %v530_v43, %v1034_v29 }
 0x4f5   :  { %v532_v45 = vsel %vm59_vm1, %v531_v44, -inf }
 0x4f6   :  { %533 = vmax.xlane.f32.xlu1 %v532_v45 }
 0x50f   :  { %628 = vrot.lane.b32.xlu1 %v1049_v42, %s953_s26 }
 0x517   :  { %753 = vrot.lane.b32.xlu1 %v1049_v42, %s956_s5 }
 0x51f   :  { %230 = vrot.lane.b32.xlu1 %v1062_v49, %s958_s0 }
 0x527   :  { %386 = vrot.lane.b32.xlu1 %v382_v21, %s959_s8 }
 0x569   :  { %v534_v46 = vpop.xlane.xlu1 %533 }
 0x56a   :  { %v535_v47 = vsub.f32 %v531_v44, %v534_v46 }
 0x56c   :  { %v536_v48 = vmul.f32 1.442695, %v535_v47 }
 0x56e   :  { %911 = vpow2.f32 %v536_v48 }
 0x574   :  { %v912_v50 = vpop.eup %911 }
 0x575   :  { %v538_v51 = vsel %vm59_vm1, %v912_v50, 0.0 }
 0x576   :  { %539 = vadd.xlane.f32.xlu2 %v538_v51 }
 0x581   :  { %v629_v52 = vpop.permute.xlu1 %628 }
 0x582   :  { %871 = vmatpush.xpose.msk.msrb.mxu1 %vm59_vm1, %v629_v52  ;;  %873 = vmatpush.xpose.msk.msra.mxu2 %vm59_vm1, %v629_v52 }
 0x585   :  { %872 = vmatmul.msk.f32.vlgmr.msrb.gmra.mxu1 %vm59_vm1, %v627_v53 }
 0x589   :  { %v754_v49 = vpop.permute.xlu1 %753 }
 0x58a   :  { %771 = vmatpush.msra.mxu1 %v754_v49 }
 0x591   :  { %v231_v54 = vpop.permute.xlu1 %230 }
 0x592   :  { %234 = vst.msk [vmem:[#allocation2] sm:$0xff] %vm233_vm8, %v231_v54 }
 0x599   :  { %v387_v55 = vpop.permute.xlu1 %386 }
 0x59a   :  { %390 = vst.msk [vmem:[#allocation2] sm:$0xff] %vm389_vm9, %v387_v55 }
 0x5e9   :  { %v540_v56 = vpop.xlane.xlu2 %539 }
 0x5ea   :  { %913 = vrcp.f32 %v540_v56 }
 0x5f0   :  { %v914_v57 = vpop.eup %913 }
 0x5f1   :  { %v542_v58 = vmul.f32 %v914_v57, %v912_v50 }
 0x5f3   :  { %867 = vmatmul.msk.f32.vlgmr.msrb.gmra.mxu2 %vm59_vm1, %v542_v58  ;;  %868 = vmatmul.msk.f32.vlgmr.msrb.gmra.mxu3 %vm59_vm1, %v542_v58 }
 0x5f4   :  { %806 = vmatpush.msrb.mxu2 %v786_v19 }
 0x5fb   :  { %874 = vmatmul.msk.f32.vlgmr.msra.gmra.mxu2 %vm59_vm1, %v599_v20  ;;  %876 = vmatmul.msk.f32.vlgmr.msra.gmra.mxu3 %vm59_vm1, %v627_v53  ;;  %v783_v20 = vld [vmem:[%s1153_s2] sm:$0xff] }
 0x602   :  { %v651_v61 = vpop.f32.mrf.mxu1 }
 0x603   :  { %v652_v63 = vadd.f32 %v651_v61, %v623_v62 }
 0x605   :  { %v695_v3 = vmul.f32 %v652_v63, %v652_v63 }
 0x676   :  { %v566_v59 = vpop.f32.mrf.mxu2  ;;  %v590_v60 = vpop.f32.mrf.mxu3 }
 0x677   :  { %569 = vst.msk [vmem:[#allocation2 + $0x8] sm:$0xff] %vm59_vm1, %v566_v59  ;;  %594 = vrot.lane.b32.xlu1 %v590_v60, %s958_s0 }
 0x67e   :  { %v671_v0 = vpop.f32.mrf.mxu2  ;;  %v691_v1 = vpop.f32.mrf.mxu3 }
 0x67f   :  { %v694_v2 = vsub.f32 %v671_v0, %v691_v1 }
 0x681   :  { %v696_v4 = vmul.f32 %v694_v2, %v694_v2 }
 0x683   :  { %v697_v5 = vadd.f32 %v696_v4, %v695_v3 }
 0x685   :  { %915 = vrsqrt.f32 %v697_v5  ;;  %vm705_vm10 = vcmp.eq.f32.partialorder %v697_v5, inf  ;;  %v708_v13 = vand.u32 2147483648, %v697_v5  ;;  %vm707_vm11 = vcmp.eq.f32.partialorder %v697_v5, 0.0 }
 0x68b   :  { %v916_v6 = vpop.eup %915 }
 0x68c   :  { %v699_v7 = vmul.f32 %v916_v6, %v697_v5 }
 0x68e   :  { %v700_v8 = vmul.f32 %v916_v6, %v699_v7 }
 0x690   :  { %v701_v9 = vmul.f32 0.5, %v700_v8 }
 0x692   :  { %v702_v10 = vsub.f32 1.5, %v701_v9 }
 0x694   :  { %v703_v11 = vmul.f32 %v916_v6, %v702_v10 }
 0x696   :  { %v704_v12 = vmul.f32 %v703_v11, %v697_v5 }
 0x698   :  { %v706_v14 = vsel %vm705_vm10, %v697_v5, %v704_v12 }
 0x699   :  { %v709_v15 = vsel %vm707_vm11, %v708_v13, %v706_v14 }
 0x69a   :  { %v710_v16 = vmul.f32 %v709_v15, %v1034_v29  ;;  %v785_v29 = vld [vmem:[%s1153_s2 + $0x10] sm:$0xff] }
 0x69b   :  { %807 = vmatpush.msrb.mxu2 %v785_v29 }
 0x69c   :  { %v711_v17 = vsel %vm59_vm1, %v710_v16, -inf }
 0x69d   :  { %712 = vmax.xlane.f32.xlu2 %v711_v17 }
 0x6b5   :  { %722 = vrot.lane.b32.xlu2 %v1049_v42, %s955_s30  ;;  %v784_v42 = vld [vmem:[%s1153_s2 + $0x8] sm:$0xff]  ;;  %s961_s2 = smov [#allocation4]  }
 0x6b6   :  { %808 = vmatpush.msrb.mxu2 %v784_v42  ;;  %s823_s18 = sshll.u32 %s961_s2, 4  ;;  %s824_s18 = int_to_ptr.vmem [resolvable:$true] %s823_s18 }
 0x6b8   :  { %809 = vmatpush.msrb.mxu2 %v783_v20 }
 0x6bd   :  { %415 = vrot.lane.b32.xlu2 %v1093_v22, %s960_s9 }
 0x6e9   :  { %v595_v18 = vpop.permute.xlu1 %594 }
 0x6ea   :  { %597 = vst.msk [vmem:[#allocation2 + $0x8] sm:$0xff] %vm233_vm8, %v595_v18 }
 0x710   :  { %v713_v21 = vpop.xlane.xlu2 %712 }
 0x711   :  { %v714_v22 = vsub.f32 %v710_v16, %v713_v21 }
 0x713   :  { %v715_v23 = vmul.f32 1.442695, %v714_v22 }
 0x715   :  { %917 = vpow2.f32 %v715_v23 }
 0x718   :  { %v723_v24 = vpop.permute.xlu2 %722 }
 0x719   :  { %743 = vmatpush.msrb.mxu0 %v723_v24 }
 0x71b   :  { %v918_v25 = vpop.eup %917 }
 0x71c   :  { %v717_v26 = vsel %vm59_vm1, %v918_v25, 0.0 }
 0x71d   :  { %718 = vadd.xlane.f32.xlu0 %v717_v26 }
 0x720   :  { %v416_v27 = vpop.permute.xlu2 %415 }
 0x721   :  { %419 = vst.msk [vmem:[#allocation2] sm:$0xff] %vm418_vm12, %v416_v27 }
 0x728   :  { %v781_v28 = vld [vmem:[#allocation2] sm:$0xff] }
 0x729   :  { %879 = vmatmul.msk.f32.vlgmr.msrb.gmra.mxu2 %vm787_vm13, %v781_v28 }
 0x790   :  { %v719_v30 = vpop.xlane.xlu0 %718 }
 0x791   :  { %919 = vrcp.f32 %v719_v30 }
 0x797   :  { %v920_v31 = vpop.eup %919 }
 0x798   :  { %v721_v32 = vmul.f32 %v920_v31, %v918_v25 }
 0x79a   :  { %877 = vmatmul.msk.f32.vlgmr.msrb.gmra.mxu0 %vm59_vm1, %v721_v32  ;;  %878 = vmatmul.msk.f32.vlgmr.msra.gmra.mxu1 %vm59_vm1, %v721_v32 }
 0x7ac   :  { %v811_v33 = vpop.f32.mrf.mxu2 }
 0x7ad   :  { %817 = vst.msk [vmem:[#allocation4] sm:$0xff] %vm23_vm0, %v811_v33 }
 0x817   :  { %v745_v34 = vpop.f32.mrf.mxu0  ;;  %v773_v35 = vpop.f32.mrf.mxu1 }
 0x818   :  { %749 = vrot.lane.b32.xlu2 %v745_v34, %s959_s8  ;;  %777 = vrot.lane.b32.xlu1 %v773_v35, %s960_s9 }
 0x872   :  { %v750_v36 = vpop.permute.xlu2 %749 }
 0x873   :  { %752 = vst.msk [vmem:[#allocation2 + $0x8] sm:$0xff] %vm389_vm9, %v750_v36 }
 0x88a   :  { %v778_v37 = vpop.permute.xlu1 %777 }
 0x88b   :  { %780 = vst.msk [vmem:[#allocation2 + $0x8] sm:$0xff] %vm418_vm12, %v778_v37 }
 0x892   :  { %v782_v38 = vld [vmem:[#allocation2 + $0x8] sm:$0xff] }
 0x893   :  { %880 = vmatmul.msk.f32.gmra.mxu2 %vm787_vm13, %v782_v38 }
 0x916   :  { %v814_v39 = vpop.f32.mrf.mxu2 }
 0x917   :  { %818 = vst.msk [vmem:[#allocation4 + $0x8] sm:$0xff] %vm23_vm0, %v814_v39 }
 0x918   :  { %831 = dma.vmem_to_hbm [thread:$0]  %s824_s18, 256, %s826_s21, [#allocation5], %s962_s22, %s962_s22, %s959_s8  }
 0x919   :  { %945 = dma.done.wait [#allocation5], 256  }
 0x91a   :  { %946 = vsyncadd [#allocation5], 4294967040 }
 0x91b   :  { %836 = vsyncpa [#allocation5], 1 }

</bundles_post_ra>
